<compile_context>
chip_gen: v5e
topology: v5e:2x2
jax: 0.10.0
libtpu: 0.0.40
codegen_flags: <defaults>
</compile_context>

<pallas_src>
import functools
import math

import jax
import jax.numpy as jnp
from jax.experimental import pallas as pl
from jax.experimental.pallas import tpu as pltpu

EPS = 1e-6


# ----------------------------------------------------------------------------
# Pallas kernels
# ----------------------------------------------------------------------------
def _stem_kernel(p_ref, w_ref, b_ref, g_ref, beta_ref, o_ref):
    # Conv(k=4,s=4) as patch matmul (bf16 in / f32 acc) fused with channels-first LN.
    y = jnp.dot(p_ref[...].astype(jnp.bfloat16), w_ref[...],
                preferred_element_type=jnp.float32) + b_ref[...]
    mu = jnp.mean(y, axis=-1, keepdims=True)
    var = jnp.mean((y - mu) ** 2, axis=-1, keepdims=True)
    o_ref[...] = (y - mu) * jax.lax.rsqrt(var + EPS) * g_ref[...] + beta_ref[...]


def _ds_kernel(x0_ref, x1_ref, x2_ref, x3_ref, w_ref, b_ref, g_ref, beta_ref,
               o_ref):
    # channels-first LN fused with Conv(k=2,s=2): one (C,dim) matmul per patch
    # position (the 4 pixels of a 2x2 patch arrive as 4 separate (TP,C) tiles),
    # accumulated in f32.
    acc = None
    for k, xr in enumerate((x0_ref, x1_ref, x2_ref, x3_ref)):
        x = xr[...]
        mu = jnp.mean(x, axis=-1, keepdims=True)
        var = jnp.mean((x - mu) ** 2, axis=-1, keepdims=True)
        xn = (x - mu) * jax.lax.rsqrt(var + EPS) * g_ref[...] + beta_ref[...]
        d = jnp.dot(xn.astype(jnp.bfloat16), w_ref[k],
                    preferred_element_type=jnp.float32)
        acc = d if acc is None else acc + d
    o_ref[...] = acc + b_ref[...]


def _block_kernel(xp_ref, xc_ref, xn_ref, dww_ref, dwb_ref, lng_ref, lnb_ref,
                  w1_ref, b1_ref, w2_ref, b2_ref, gamma_ref, o_ref, win_ref,
                  *, ht, flat_mlp):
    # Fused ConvNext block on one (1, TH, W, C) row-tile:
    #   dwconv7x7 -> LN(channels_last) -> Linear -> GELU -> Linear -> gamma -> +res
    i = pl.program_id(1)
    _, TH, W, C = xc_ref.shape

    # --- assemble zero-padded (TH+6, W+6, C) conv window in VMEM scratch -----
    zrow = jnp.zeros((3, W + 6, C), jnp.float32)
    win_ref[0:3, :, :] = zrow
    win_ref[TH + 3:TH + 6, :, :] = zrow
    zcol = jnp.zeros((TH, 3, C), jnp.float32)
    win_ref[3:TH + 3, 0:3, :] = zcol
    win_ref[3:TH + 3, W + 3:W + 6, :] = zcol
    win_ref[3:TH + 3, 3:W + 3, :] = xc_ref[0]
    if ht > 1:  # bring in the H halo from the neighbouring tiles (zeros at edges)
        @pl.when(i > 0)
        def _():
            win_ref[0:3, 3:W + 3, :] = xp_ref[0, TH - 3:TH, :, :]

        @pl.when(i < ht - 1)
        def _():
            win_ref[TH + 3:TH + 6, 3:W + 3, :] = xn_ref[0, 0:3, :, :]

    win = win_ref[...]
    w = dww_ref[...]                                   # (49, C)

    # --- depthwise 7x7, 7 independent partial accumulators (ILP) -------------
    parts = []
    for kh in range(7):
        p = win[kh:kh + TH, 0:W, :] * w[kh * 7, :]
        for kw in range(1, 7):
            p = p + win[kh:kh + TH, kw:kw + W, :] * w[kh * 7 + kw, :]
        parts.append(p)
    dw = ((parts[0] + parts[1]) + (parts[2] + parts[3])
          + ((parts[4] + parts[5]) + parts[6]) + dwb_ref[...])    # (TH, W, C)

    w1 = w1_ref[...]
    w2 = w2_ref[...]
    inv_sqrt2 = 1.0 / math.sqrt(2.0)

    def mlp(h2d):                                       # (M, C) -> (M, C)
        mu = jnp.mean(h2d, axis=-1, keepdims=True)
        var = jnp.mean((h2d - mu) ** 2, axis=-1, keepdims=True)
        hn = (h2d - mu) * jax.lax.rsqrt(var + EPS) * lng_ref[...] + lnb_ref[...]
        u = jnp.dot(hn.astype(jnp.bfloat16), w1,
                    preferred_element_type=jnp.float32) + b1_ref[...]
        u = 0.5 * u * (1.0 + jax.lax.erf(u * inv_sqrt2))           # exact GELU
        v = jnp.dot(u.astype(jnp.bfloat16), w2,
                    preferred_element_type=jnp.float32) + b2_ref[...]
        return gamma_ref[...] * v

    if flat_mlp:
        # W is sublane-aligned: one big matmul over all TH*W pixels.
        y = mlp(dw.reshape(TH * W, C))
        o_ref[0] = xc_ref[0] + y.reshape(TH, W, C)
    else:
        # W not a multiple of 8: stay 2-D per output row (avoids layout reshape).
        for r in range(TH):
            o_ref[0, r] = xc_ref[0, r] + mlp(dw[r])


# ----------------------------------------------------------------------------
# pallas_call wrappers
# ----------------------------------------------------------------------------
def _tile_rows(P, target=512):
    """Largest multiple-of-8 divisor of P that is <= target (else P itself)."""
    best = None
    for d in range(8, min(P, target) + 1, 8):
        if P % d == 0:
            best = d
    return best if best is not None else P


def _choose_block_rows(H, W):
    """Largest divisor of H (>=3 when possible) keeping <= ~1024 rows per tile."""
    divs = [d for d in range(1, H + 1) if H % d == 0]
    valid = [d for d in divs if d >= min(3, H)]
    fitting = [d for d in valid if d * W <= 1024]
    return max(fitting) if fitting else min(valid)


def _stem_conv_ln(patches, ds):
    P, kin = patches.shape
    dim = ds["conv_w"].shape[1]
    TP = _tile_rows(P)
    return pl.pallas_call(
        _stem_kernel,
        grid=(P // TP,),
        in_specs=[
            pl.BlockSpec((TP, kin), lambda i: (i, 0)),
            pl.BlockSpec((kin, dim), lambda i: (0, 0)),
            pl.BlockSpec((1, dim), lambda i: (0, 0)),
            pl.BlockSpec((1, dim), lambda i: (0, 0)),
            pl.BlockSpec((1, dim), lambda i: (0, 0)),
        ],
        out_specs=pl.BlockSpec((TP, dim), lambda i: (i, 0)),
        out_shape=jax.ShapeDtypeStruct((P, dim), jnp.float32),
        compiler_params=pltpu.CompilerParams(dimension_semantics=("parallel",)),
    )(patches, ds["conv_w"], ds["conv_b"], ds["ln_g"], ds["ln_b"])


def _ds_ln_conv(xs, ds):
    P, C = xs[0].shape
    dim = ds["conv_w"].shape[2]
    TP = _tile_rows(P)
    xspec = pl.BlockSpec((TP, C), lambda i: (i, 0))
    return pl.pallas_call(
        _ds_kernel,
        grid=(P // TP,),
        in_specs=[
            xspec, xspec, xspec, xspec,
            pl.BlockSpec((4, C, dim), lambda i: (0, 0, 0)),
            pl.BlockSpec((1, dim), lambda i: (0, 0)),
            pl.BlockSpec((1, C), lambda i: (0, 0)),
            pl.BlockSpec((1, C), lambda i: (0, 0)),
        ],
        out_specs=pl.BlockSpec((TP, dim), lambda i: (i, 0)),
        out_shape=jax.ShapeDtypeStruct((P, dim), jnp.float32),
        compiler_params=pltpu.CompilerParams(dimension_semantics=("parallel",)),
    )(xs[0], xs[1], xs[2], xs[3], ds["conv_w"], ds["conv_b"], ds["ln_g"],
      ds["ln_b"])


def _convnext_block(feat, blk):
    N, H, W, C = feat.shape
    TH = _choose_block_rows(H, W)
    HT = H // TH
    kern = functools.partial(_block_kernel, ht=HT, flat_mlp=(W % 8 == 0))

    tile = (1, TH, W, C)
    in_specs = [
        pl.BlockSpec(tile, lambda n, i: (n, jnp.maximum(i - 1, 0), 0, 0)),   # prev
        pl.BlockSpec(tile, lambda n, i: (n, i, 0, 0)),                       # cur (also residual)
        pl.BlockSpec(tile, lambda n, i: (n, jnp.minimum(i + 1, HT - 1), 0, 0)),  # next
        pl.BlockSpec((49, C), lambda n, i: (0, 0)),        # dw weight
        pl.BlockSpec((1, C), lambda n, i: (0, 0)),         # dw bias
        pl.BlockSpec((1, C), lambda n, i: (0, 0)),         # ln gamma
        pl.BlockSpec((1, C), lambda n, i: (0, 0)),         # ln beta
        pl.BlockSpec((C, 4 * C), lambda n, i: (0, 0)),     # pwconv1 w (bf16)
        pl.BlockSpec((1, 4 * C), lambda n, i: (0, 0)),     # pwconv1 b
        pl.BlockSpec((4 * C, C), lambda n, i: (0, 0)),     # pwconv2 w (bf16)
        pl.BlockSpec((1, C), lambda n, i: (0, 0)),         # pwconv2 b
        pl.BlockSpec((1, C), lambda n, i: (0, 0)),         # layer-scale gamma
    ]
    return pl.pallas_call(
        kern,
        grid=(N, HT),
        in_specs=in_specs,
        out_specs=pl.BlockSpec(tile, lambda n, i: (n, i, 0, 0)),
        out_shape=jax.ShapeDtypeStruct((N, H, W, C), jnp.float32),
        scratch_shapes=[pltpu.VMEM((TH + 6, W + 6, C), jnp.float32)],
        compiler_params=pltpu.CompilerParams(
            dimension_semantics=("parallel", "parallel")),
    )(feat, feat, feat, blk["dw_w"], blk["dw_b"], blk["ln_g"], blk["ln_b"],
      blk["w1"], blk["b1"], blk["w2"], blk["b2"], blk["gamma"])


# ----------------------------------------------------------------------------
# Glue
# ----------------------------------------------------------------------------
def _patchify_nchw(x_nchw, p):
    # NCHW -> (N*Ho*Wo, C*p*p), patch flattened in (c, kh, kw) order
    # (matches torch Conv2d weight layout (out, in, kh, kw)).
    N, C, H, W = x_nchw.shape
    x = x_nchw.reshape(N, C, H // p, p, W // p, p)
    x = x.transpose(0, 2, 4, 1, 3, 5)
    return x.reshape(N * (H // p) * (W // p), C * p * p)


class ConvNeXtPallas:
    """ConvNeXt(index, depths, base_dim, ...) forward, Pallas-backed."""

    def __init__(self, index, depths, base_dim, in_chans=3,
                 drop_path_rate=0.0, layer_scale_init_value=1e-6, seed=0):
        assert drop_path_rate == 0.0  # TODO(synk): stochastic DropPath (rate>0) not implemented; identity at 0.
        dims = [base_dim, base_dim * 2, base_dim * 4, base_dim * 8]
        self.index = index
        dim = dims[index]
        self.dim = dim

        key = jax.random.PRNGKey(seed)

        def nrm(k, shape, dtype=jnp.float32):
            # trunc_normal_(std=0.02) approximated with a plain normal
            return (0.02 * jax.random.normal(k, shape, jnp.float32)).astype(dtype)

        k0, key = jax.random.split(key)
        if index == 0:
            kin = in_chans * 4 * 4
            # TODO(synk): loading real torch weights needs (dim,in,4,4)->(in*16,dim) reshape.
            self.ds = dict(
                conv_w=nrm(k0, (kin, dim), jnp.bfloat16),
                conv_b=jnp.zeros((1, dim), jnp.float32),
                ln_g=jnp.ones((1, dim), jnp.float32),
                ln_b=jnp.zeros((1, dim), jnp.float32),
            )
            self.patch = 4
        else:
            cin = dims[index - 1]
            self.ds = dict(
                ln_g=jnp.ones((1, cin), jnp.float32),
                ln_b=jnp.zeros((1, cin), jnp.float32),
                conv_w=nrm(k0, (4, cin, dim), jnp.bfloat16),   # (kh*2+kw, cin, dim)
                conv_b=jnp.zeros((1, dim), jnp.float32),
            )
            self.patch = 2

        gamma0 = layer_scale_init_value if layer_scale_init_value > 0 else 1.0
        self.blocks = []
        for _ in range(depths[index]):
            kdw, kw1, kw2, key = jax.random.split(key, 4)
            self.blocks.append(dict(
                dw_w=nrm(kdw, (49, dim)),
                dw_b=jnp.zeros((1, dim), jnp.float32),
                ln_g=jnp.ones((1, dim), jnp.float32),
                ln_b=jnp.zeros((1, dim), jnp.float32),
                w1=nrm(kw1, (dim, 4 * dim), jnp.bfloat16),
                b1=jnp.zeros((1, 4 * dim), jnp.float32),
                w2=nrm(kw2, (4 * dim, dim), jnp.bfloat16),
                b2=jnp.zeros((1, dim), jnp.float32),
                gamma=jnp.full((1, dim), gamma0, jnp.float32),
            ))

    def __call__(self, x_nchw):
        x = x_nchw.astype(jnp.float32)
        N, C, H, W = x.shape
        p = self.patch
        Ho, Wo, dim = H // p, W // p, self.dim
        P = N * Ho * Wo

        if self.index == 0:
            patches = _patchify_nchw(x, p)                       # (P, in_chans*16)
            y = _stem_conv_ln(patches, self.ds)                  # conv + LN fused
        else:
            x_nhwc = jnp.transpose(x, (0, 2, 3, 1))              # channels-last
            xs = [x_nhwc[:, kh::2, kw::2, :].reshape(P, C)
                  for kh in range(2) for kw in range(2)]
            y = _ds_ln_conv(xs, self.ds)                         # LN + conv fused

        feat = y.reshape(N, Ho, Wo, dim)                         # NHWC
        for blk in self.blocks:
            feat = _convnext_block(feat, blk)                    # fully fused block
        return jnp.transpose(feat, (0, 3, 1, 2))                 # back to NCHW


if __name__ == "__main__":
    key = jax.random.PRNGKey(0)
    k0, k1 = jax.random.split(key)

    # stage 0 (stem): Conv(k4,s4)+LN_cf, then 2 ConvNext blocks at dim=32
    x0 = jax.random.normal(k0, (2, 3, 32, 32), jnp.float32)      # NCHW
    m0 = ConvNeXtPallas(index=0, depths=(2, 2, 2, 2), base_dim=32, in_chans=3,
                        drop_path_rate=0.0, layer_scale_init_value=1e-6, seed=0)
    y0 = jax.block_until_ready(m0(x0))
    assert y0.shape == (2, 32, 8, 8), y0.shape
    assert bool(jnp.all(jnp.isfinite(y0)))

    # stage 1: LN_cf + Conv(k2,s2) (32->64), then 2 ConvNext blocks at dim=64
    x1 = jax.random.normal(k1, (2, 32, 16, 16), jnp.float32)     # NCHW
    m1 = ConvNeXtPallas(index=1, depths=(2, 2, 2, 2), base_dim=32, in_chans=3,
                        drop_path_rate=0.0, layer_scale_init_value=1e-6, seed=0)
    y1 = jax.block_until_ready(m1(x1))
    assert y1.shape == (2, 64, 8, 8), y1.shape
    assert bool(jnp.all(jnp.isfinite(y1)))

    print("KERNEL_OK")
</pallas_src>

<mosaic_0001>
module attributes {stable_mosaic.version = 11 : i64} {
  func.func @_stem_kernel(%arg0: i32, %arg1: memref<128x48xf32, #tpu.memory_space<vmem>>, %arg2: memref<48x32xbf16, #tpu.memory_space<vmem>>, %arg3: memref<1x32xf32, #tpu.memory_space<vmem>>, %arg4: memref<1x32xf32, #tpu.memory_space<vmem>>, %arg5: memref<1x32xf32, #tpu.memory_space<vmem>>, %arg6: memref<128x32xf32, #tpu.memory_space<vmem>>) attributes {dimension_semantics = [#tpu.dimension_semantics<parallel>], iteration_bounds = array<i64: 1>, scalar_prefetch = 0 : i64, scratch_operands = 0 : i64, tpu.core_type = #tpu.core_type<tc>, window_params = [{transform_indices = @transform_0, window_bounds = array<i64: 128, 48>}, {pipeline_mode = #tpu.pipeline_mode<synchronous>, transform_indices = @transform_1, window_bounds = array<i64: 48, 32>}, {pipeline_mode = #tpu.pipeline_mode<synchronous>, transform_indices = @transform_2, window_bounds = array<i64: 1, 32>}, {pipeline_mode = #tpu.pipeline_mode<synchronous>, transform_indices = @transform_3, window_bounds = array<i64: 1, 32>}, {pipeline_mode = #tpu.pipeline_mode<synchronous>, transform_indices = @transform_4, window_bounds = array<i64: 1, 32>}, {transform_indices = @transform_5, window_bounds = array<i64: 128, 32>}]} {
    %c0 = arith.constant 0 : index
    %c0_0 = arith.constant 0 : index
    %0 = vector.load %arg1[%c0, %c0_0] : memref<128x48xf32, #tpu.memory_space<vmem>>, vector<128x48xf32>
    %1 = arith.truncf %0 : vector<128x48xf32> to vector<128x48xbf16>
    %c0_1 = arith.constant 0 : index
    %c0_2 = arith.constant 0 : index
    %2 = vector.load %arg2[%c0_1, %c0_2] : memref<48x32xbf16, #tpu.memory_space<vmem>>, vector<48x32xbf16>
    %cst = arith.constant dense<0.000000e+00> : vector<128x32xf32>
    %3 = tpu.matmul %1, %2, %cst {dimension_numbers = #tpu.dot_dimension_numbers<[1], [0], [0], [1], [0, 0, 1, 1], [], []>} : vector<128x48xbf16>, vector<48x32xbf16>, vector<128x32xf32> -> vector<128x32xf32>
    %c0_3 = arith.constant 0 : index
    %c0_4 = arith.constant 0 : index
    %4 = vector.load %arg3[%c0_3, %c0_4] : memref<1x32xf32, #tpu.memory_space<vmem>>, vector<1x32xf32>
    %5 = vector.broadcast %4 : vector<1x32xf32> to vector<128x32xf32>
    %6 = arith.addf %3, %5 : vector<128x32xf32>
    %cst_5 = arith.constant dense<0.000000e+00> : vector<128xf32>
    %7 = vector.multi_reduction <add>, %6, %cst_5 [1] : vector<128x32xf32> to vector<128xf32>
    %8 = vector.shape_cast %7 : vector<128xf32> to vector<128x1xf32>
    %cst_6 = arith.constant 3.200000e+01 : f32
    %9 = vector.broadcast %cst_6 : f32 to vector<128x1xf32>
    %10 = arith.divf %8, %9 : vector<128x1xf32>
    %11 = vector.broadcast %10 : vector<128x1xf32> to vector<128x32xf32>
    %12 = arith.subf %6, %11 : vector<128x32xf32>
    %13 = arith.mulf %12, %12 : vector<128x32xf32>
    %cst_7 = arith.constant dense<0.000000e+00> : vector<128xf32>
    %14 = vector.multi_reduction <add>, %13, %cst_7 [1] : vector<128x32xf32> to vector<128xf32>
    %15 = vector.shape_cast %14 : vector<128xf32> to vector<128x1xf32>
    %cst_8 = arith.constant 3.200000e+01 : f32
    %16 = vector.broadcast %cst_8 : f32 to vector<128x1xf32>
    %17 = arith.divf %15, %16 : vector<128x1xf32>
    %18 = vector.broadcast %10 : vector<128x1xf32> to vector<128x32xf32>
    %19 = arith.subf %6, %18 : vector<128x32xf32>
    %cst_9 = arith.constant 9.99999997E-7 : f32
    %20 = vector.broadcast %cst_9 : f32 to vector<128x1xf32>
    %21 = arith.addf %17, %20 : vector<128x1xf32>
    %22 = math.rsqrt %21 : vector<128x1xf32>
    %23 = vector.broadcast %22 : vector<128x1xf32> to vector<128x32xf32>
    %24 = arith.mulf %19, %23 : vector<128x32xf32>
    %c0_10 = arith.constant 0 : index
    %c0_11 = arith.constant 0 : index
    %25 = vector.load %arg4[%c0_10, %c0_11] : memref<1x32xf32, #tpu.memory_space<vmem>>, vector<1x32xf32>
    %26 = vector.broadcast %25 : vector<1x32xf32> to vector<128x32xf32>
    %27 = arith.mulf %24, %26 : vector<128x32xf32>
    %c0_12 = arith.constant 0 : index
    %c0_13 = arith.constant 0 : index
    %28 = vector.load %arg5[%c0_12, %c0_13] : memref<1x32xf32, #tpu.memory_space<vmem>>, vector<1x32xf32>
    %29 = vector.broadcast %28 : vector<1x32xf32> to vector<128x32xf32>
    %30 = arith.addf %27, %29 : vector<128x32xf32>
    %c0_14 = arith.constant 0 : index
    %c0_15 = arith.constant 0 : index
    %31 = vector.load %arg6[%c0_14, %c0_15] : memref<128x32xf32, #tpu.memory_space<vmem>>, vector<128x32xf32>
    tpu.vector_store %arg6[%c0_14, %c0_15], %30 {strides = array<i32>} : memref<128x32xf32, #tpu.memory_space<vmem>>, vector<128x32xf32>,
    return
  }
  func.func @transform_0(%arg0: i32) -> (i32, i32) {
    %c0_i32 = arith.constant 0 : i32
    %c0_i32_0 = arith.constant 0 : i32
    return %arg0, %c0_i32 : i32, i32
  }
  func.func @transform_1(%arg0: i32) -> (i32, i32) {
    %c0_i32 = arith.constant 0 : i32
    %c0_i32_0 = arith.constant 0 : i32
    %c0_i32_1 = arith.constant 0 : i32
    return %c0_i32, %c0_i32_0 : i32, i32
  }
  func.func @transform_2(%arg0: i32) -> (i32, i32) {
    %c0_i32 = arith.constant 0 : i32
    %c0_i32_0 = arith.constant 0 : i32
    %c0_i32_1 = arith.constant 0 : i32
    return %c0_i32, %c0_i32_0 : i32, i32
  }
  func.func @transform_3(%arg0: i32) -> (i32, i32) {
    %c0_i32 = arith.constant 0 : i32
    %c0_i32_0 = arith.constant 0 : i32
    %c0_i32_1 = arith.constant 0 : i32
    return %c0_i32, %c0_i32_0 : i32, i32
  }
  func.func @transform_4(%arg0: i32) -> (i32, i32) {
    %c0_i32 = arith.constant 0 : i32
    %c0_i32_0 = arith.constant 0 : i32
    %c0_i32_1 = arith.constant 0 : i32
    return %c0_i32, %c0_i32_0 : i32, i32
  }
  func.func @transform_5(%arg0: i32) -> (i32, i32) {
    %c0_i32 = arith.constant 0 : i32
    %c0_i32_0 = arith.constant 0 : i32
    return %arg0, %c0_i32 : i32, i32
  }
}

</mosaic_0001>

<bundles_post_ra>
// kernel: tpu_custom_call.1
= control target key start
LH: loop header
LB: loop body
LE: loop exit
PB: predicated region body
PF: predicated region fallthrough
CT: control target
= control target key end

     0   :  { %vm73_vm0 = vcmask 392192   ;;  %vm147_vm1 = vcmask 261120   ;;  %s1160_s1 = inlined_call_operand.vmem [shape: bf16[48,32], index: 1, kind: input, shape index: {}]   ;;  %s1161_s0 = inlined_call_operand.vmem [shape: f32[128,48], index: 0, kind: input, shape index: {}]   ;;  %s1162_s2 = inlined_call_operand.vmem [shape: f32[1,32], index: 2, kind: input, shape index: {}]   ;;  %s1163_s3 = inlined_call_operand.vmem [shape: f32[1,32], index: 3, kind: input, shape index: {}]   ;;  %s1164_s4 = inlined_call_operand.vmem [shape: f32[1,32], index: 4, kind: input, shape index: {}]   ;;  %s1165_s5 = inlined_call_operand.vmem [shape: f32[128,32], index: 5, kind: output, shape index: {}]  }
   0x1   :  { %v589_v0 = vld [vmem:[%s1160_s1 + $0x10] sm:$0xff]  ;;  %v588_v1 = vld [vmem:[%s1160_s1 + $0x8] sm:$0xff]  ;;  %v587_v2 = vld [vmem:[%s1160_s1] sm:$0xff] }
   0x2   :  { %103 = vmatpush.bf16.msra.mxu0 %v589_v0  ;;  %590 = vmatpush.bf16.msra.mxu1 %v589_v0  ;;  %v21_v3 = vld [vmem:[%s1161_s0] sm:$0xff]  ;;  %v22_v4 = vld [vmem:[%s1161_s0 + $0x8] sm:$0xff]  ;;  %v23_v15 = vld [vmem:[%s1161_s0 + $0x10] sm:$0xff] }
   0x3   :  { %591 = vmatpush.bf16.msra.mxu2 %v589_v0  ;;  %592 = vmatpush.bf16.msra.mxu3 %v589_v0  ;;  %v25_v5 = vld [vmem:[%s1161_s0 + $0x20] sm:$0xff]  ;;  %v26_v6 = vld [vmem:[%s1161_s0 + $0x28] sm:$0xff]  ;;  %v37_v11 = vpack.c.bf16 %v22_v4, %v21_v3  ;;  %v24_v16 = vld [vmem:[%s1161_s0 + $0x18] sm:$0xff] }
   0x4   :  { %v29_v7 = vld [vmem:[%s1161_s0 + $0x40] sm:$0xff]  ;;  %v30_v8 = vld [vmem:[%s1161_s0 + $0x48] sm:$0xff]  ;;  %v39_v12 = vpack.c.bf16 %v26_v6, %v25_v5  ;;  %v31_v17 = vld [vmem:[%s1161_s0 + $0x50] sm:$0xff]  ;;  %v38_v23 = vpack.c.bf16 %v24_v16, %v23_v15 }
   0x5   :  { %v33_v9 = vld [vmem:[%s1161_s0 + $0x60] sm:$0xff]  ;;  %v34_v10 = vld [vmem:[%s1161_s0 + $0x68] sm:$0xff]  ;;  %v41_v13 = vpack.c.bf16 %v30_v8, %v29_v7  ;;  %v27_v18 = vld [vmem:[%s1161_s0 + $0x30] sm:$0xff] }
   0x6   :  { %104 = vmatpush.bf16.msra.mxu0 %v588_v1  ;;  %593 = vmatpush.bf16.msra.mxu1 %v588_v1  ;;  %v43_v14 = vpack.c.bf16 %v34_v10, %v33_v9  ;;  %v28_v19 = vld [vmem:[%s1161_s0 + $0x38] sm:$0xff]  ;;  %v35_v21 = vld [vmem:[%s1161_s0 + $0x70] sm:$0xff]  ;;  %v736_v27 = vld [vmem:[%s1162_s2] ss:$0 sm:$0xff] }
   0x7   :  { %594 = vmatpush.bf16.msra.mxu2 %v588_v1  ;;  %595 = vmatpush.bf16.msra.mxu3 %v588_v1  ;;  %v32_v20 = vld [vmem:[%s1161_s0 + $0x58] sm:$0xff]  ;;  %v40_v24 = vpack.c.bf16 %v28_v19, %v27_v18 }
   0x8   :  { %v36_v22 = vld [vmem:[%s1161_s0 + $0x78] sm:$0xff]  ;;  %v42_v25 = vpack.c.bf16 %v32_v20, %v31_v17 }
   0x9   :  { %v44_v26 = vpack.c.bf16 %v36_v22, %v35_v21 }
   0xa   :  { %105 = vmatpush.bf16.msra.mxu0 %v587_v2  ;;  %596 = vmatpush.bf16.msra.mxu1 %v587_v2 }
   0xb   :  { %597 = vmatpush.bf16.msra.mxu2 %v587_v2  ;;  %598 = vmatpush.bf16.msra.mxu3 %v587_v2 }
   0xd   :  { %579 = vmatmul.msk.bf16.vlgmr.msra.gmra.mxu0 %vm73_vm0, %v37_v11  ;;  %581 = vmatmul.msk.bf16.vlgmr.msra.gmra.mxu1 %vm73_vm0, %v39_v12  ;;  %v637_v12 = vmov 32.0  }
   0xe   :  { %583 = vmatmul.msk.bf16.vlgmr.msra.gmra.mxu2 %vm73_vm0, %v41_v13  ;;  %585 = vmatmul.msk.bf16.vlgmr.msra.gmra.mxu3 %vm73_vm0, %v43_v14  ;;  %603 = vrcp.f32 %v637_v12 }
  0x14   :  { %v604_v13 = vpop.eup %603 }
  0x15   :  { %v197_v14 = vmul.f32 32.0, %v604_v13  ;;  %vm201_vm2 = vweird.f32 %v604_v13 }
  0x17   :  { %v198_v15 = vsub.f32 1.0, %v197_v14 }
  0x19   :  { %v199_v16 = vmul.f32 %v604_v13, %v198_v15 }
  0x1b   :  { %v200_v17 = vadd.f32 %v604_v13, %v199_v16 }
  0x1d   :  { %580 = vmatmul.msk.bf16.gmra.mxu0 %vm73_vm0, %v38_v23  ;;  %582 = vmatmul.msk.bf16.gmra.mxu1 %vm73_vm0, %v40_v24  ;;  %v818_v18 = vsel %vm201_vm2, %v604_v13, %v200_v17 }
  0x1e   :  { %584 = vmatmul.msk.bf16.gmra.mxu2 %vm73_vm0, %v42_v25  ;;  %586 = vmatmul.msk.bf16.gmra.mxu3 %vm73_vm0, %v44_v26 }
  0x8a   :  { %v107_v28 = vpop.f32.mrf.mxu0  ;;  %v117_v29 = vpop.f32.mrf.mxu1 }
  0x8b   :  { %v739_v30 = vadd.f32 %v736_v27, %v107_v28  ;;  %v742_v31 = vadd.f32 %v736_v27, %v117_v29 }
  0x8d   :  { %v160_v32 = vsel %vm147_vm1, %v742_v31, 0.0  ;;  %v148_v33 = vsel %vm147_vm1, %v739_v30, 0.0 }
  0x8e   :  { %161 = vadd.xlane.f32.xlu2 %v160_v32  ;;  %149 = vadd.xlane.f32.xlu0 %v148_v33 }
  0x91   :  { %v127_v34 = vpop.f32.mrf.mxu2  ;;  %v137_v35 = vpop.f32.mrf.mxu3 }
  0x92   :  { %v749_v36 = vadd.f32 %v736_v27, %v127_v34  ;;  %v752_v37 = vadd.f32 %v736_v27, %v137_v35  ;;  %v109_v38 = vpop.f32.mrf.mxu0  ;;  %v119_v41 = vpop.f32.mrf.mxu1 }
  0x93   :  { %v759_v42 = vadd.f32 %v736_v27, %v109_v38  ;;  %v762_v43 = vadd.f32 %v736_v27, %v119_v41 }
  0x94   :  { %v172_v39 = vsel %vm147_vm1, %v749_v36, 0.0  ;;  %v184_v40 = vsel %vm147_vm1, %v752_v37, 0.0 }
  0x95   :  { %v163_v49 = vsel %vm147_vm1, %v762_v43, 0.0  ;;  %v151_v50 = vsel %vm147_vm1, %v759_v42, 0.0 }
  0x96   :  { %173 = vadd.xlane.f32.xlu2 %v172_v39  ;;  %185 = vadd.xlane.f32.xlu0 %v184_v40 }
  0x99   :  { %v129_v44 = vpop.f32.mrf.mxu2  ;;  %v139_v45 = vpop.f32.mrf.mxu3 }
  0x9a   :  { %v765_v46 = vadd.f32 %v736_v27, %v139_v45  ;;  %v112_v48 = vpop.f32.mrf.mxu0  ;;  %v777_v52 = vadd.f32 %v736_v27, %v129_v44  ;;  %v122_v58 = vpop.f32.mrf.mxu1 }
  0x9b   :  { %v774_v51 = vadd.f32 %v736_v27, %v112_v48  ;;  %v787_v59 = vadd.f32 %v736_v27, %v122_v58 }
  0x9c   :  { %v187_v47 = vsel %vm147_vm1, %v765_v46, 0.0  ;;  %v175_v56 = vsel %vm147_vm1, %v777_v52, 0.0 }
  0x9d   :  { %188 = vadd.xlane.f32.xlu1 %v187_v47  ;;  %v154_v54 = vsel %vm147_vm1, %v774_v51, 0.0  ;;  %v166_v63 = vsel %vm147_vm1, %v787_v59, 0.0 }
  0x9e   :  { %164 = vadd.xlane.f32.xlu2 %v163_v49  ;;  %152 = vadd.xlane.f32.xlu0 %v151_v50 }
  0xa1   :  { %v132_v53 = vpop.f32.mrf.mxu2  ;;  %v142_v55 = vpop.f32.mrf.mxu3 }
  0xa2   :  { %v784_v57 = vadd.f32 %v736_v27, %v132_v53  ;;  %v114_v2 = vpop.f32.mrf.mxu0  ;;  %v799_v3 = vadd.f32 %v736_v27, %v142_v55  ;;  %v124_v9 = vpop.f32.mrf.mxu1 }
  0xa3   :  { %v805_v5 = vadd.f32 %v736_v27, %v114_v2  ;;  %v814_v10 = vadd.f32 %v736_v27, %v124_v9 }
  0xa4   :  { %v178_v62 = vsel %vm147_vm1, %v784_v57, 0.0  ;;  %v190_v6 = vsel %vm147_vm1, %v799_v3, 0.0 }
  0xa5   :  { %155 = vadd.xlane.f32.xlu1 %v154_v54  ;;  %v157_v8 = vsel %vm147_vm1, %v805_v5, 0.0  ;;  %v169_v11 = vsel %vm147_vm1, %v814_v10, 0.0 }
  0xa6   :  { %176 = vadd.xlane.f32.xlu0 %v175_v56 }
  0xa9   :  { %v134_v60 = vpop.f32.mrf.mxu2  ;;  %v144_v1 = vpop.f32.mrf.mxu3 }
  0xaa   :  { %v790_v61 = vadd.f32 %v736_v27, %v134_v60  ;;  %v802_v4 = vadd.f32 %v736_v27, %v144_v1 }
  0xac   :  { %v181_v0 = vsel %vm147_vm1, %v790_v61, 0.0  ;;  %v193_v7 = vsel %vm147_vm1, %v802_v4, 0.0 }
  0xad   :  { %182 = vadd.xlane.f32.xlu2 %v181_v0  ;;  %179 = vadd.xlane.f32.xlu1 %v178_v62 }
  0xae   :  { %167 = vadd.xlane.f32.xlu0 %v166_v63 }
  0xb5   :  { %191 = vadd.xlane.f32.xlu2 %v190_v6  ;;  %158 = vadd.xlane.f32.xlu1 %v157_v8 }
  0xb6   :  { %194 = vadd.xlane.f32.xlu0 %v193_v7 }
  0xbd   :  { %170 = vadd.xlane.f32.xlu1 %v169_v11 }
 0x101   :  { %v162_v19 = vpop.xlane.xlu2 %161  ;;  %v150_v20 = vpop.xlane.xlu0 %149 }
 0x102   :  { %v207_v21 = vmul.f32 %v818_v18, %v162_v19  ;;  %v203_v22 = vmul.f32 %v818_v18, %v150_v20 }
 0x104   :  { %v823_v23 = vsub.f32 %v742_v31, %v207_v21  ;;  %v826_v24 = vsub.f32 %v739_v30, %v203_v22 }
 0x106   :  { %v239_v25 = vmul.f32 %v823_v23, %v823_v23  ;;  %v235_v26 = vmul.f32 %v826_v24, %v826_v24 }
 0x108   :  { %v263_v27 = vsel %vm147_vm1, %v239_v25, 0.0  ;;  %v251_v28 = vsel %vm147_vm1, %v235_v26, 0.0 }
 0x109   :  { %264 = vadd.xlane.f32.xlu2 %v263_v27  ;;  %v174_v29 = vpop.xlane.xlu2 %173  ;;  %252 = vadd.xlane.f32.xlu1 %v251_v28  ;;  %v186_v32 = vpop.xlane.xlu0 %185 }
 0x10a   :  { %v211_v31 = vmul.f32 %v818_v18, %v174_v29  ;;  %v215_v33 = vmul.f32 %v818_v18, %v186_v32 }
 0x10c   :  { %v837_v30 = vsub.f32 %v749_v36, %v211_v31  ;;  %v840_v34 = vsub.f32 %v752_v37, %v215_v33 }
 0x10e   :  { %v243_v35 = vmul.f32 %v837_v30, %v837_v30  ;;  %v247_v38 = vmul.f32 %v840_v34, %v840_v34 }
 0x110   :  { %v846_v39 = vpop.xlane.xlu1 %188  ;;  %v275_v40 = vsel %vm147_vm1, %v243_v35, 0.0  ;;  %v287_v41 = vsel %vm147_vm1, %v247_v38, 0.0 }
 0x111   :  { %v165_v44 = vpop.xlane.xlu2 %164  ;;  %276 = vadd.xlane.f32.xlu0 %v275_v40  ;;  %288 = vadd.xlane.f32.xlu1 %v287_v41  ;;  %v153_v36 = vpop.xlane.xlu0 %152 }
 0x112   :  { %v208_v45 = vmul.f32 %v818_v18, %v165_v44  ;;  %v204_v37 = vmul.f32 %v818_v18, %v153_v36 }
 0x114   :  { %v853_v47 = vsub.f32 %v762_v43, %v208_v45  ;;  %v856_v48 = vsub.f32 %v759_v42, %v204_v37 }
 0x116   :  { %v240_v49 = vmul.f32 %v853_v47, %v853_v47  ;;  %v236_v50 = vmul.f32 %v856_v48, %v856_v48 }
 0x118   :  { %v156_v53 = vpop.xlane.xlu1 %155  ;;  %v266_v54 = vsel %vm147_vm1, %v240_v49, 0.0  ;;  %v254_v55 = vsel %vm147_vm1, %v236_v50, 0.0 }
 0x119   :  { %v205_v56 = vmul.f32 %v818_v18, %v156_v53  ;;  %267 = vadd.xlane.f32.xlu0 %v266_v54  ;;  %255 = vadd.xlane.f32.xlu2 %v254_v55  ;;  %v177_v43 = vpop.xlane.xlu0 %176 }
 0x11a   :  { %v212_v58 = vmul.f32 %v818_v18, %v177_v43 }
 0x11b   :  { %v867_v42 = vsub.f32 %v774_v51, %v205_v56 }
 0x11c   :  { %v870_v60 = vsub.f32 %v777_v52, %v212_v58 }
 0x11d   :  { %v237_v62 = vmul.f32 %v867_v42, %v867_v42 }
 0x11e   :  { %v244_v63 = vmul.f32 %v870_v60, %v870_v60 }
 0x11f   :  { %v257_v2 = vsel %vm147_vm1, %v237_v62, 0.0 }
 0x120   :  { %v183_v0 = vpop.xlane.xlu2 %182  ;;  %v180_v1 = vpop.xlane.xlu1 %179  ;;  %v278_v6 = vsel %vm147_vm1, %v244_v63, 0.0 }
 0x121   :  { %v214_v7 = vmul.f32 %v818_v18, %v183_v0  ;;  %v213_v51 = vmul.f32 %v818_v18, %v180_v1  ;;  %258 = vadd.xlane.f32.xlu0 %v257_v2  ;;  %279 = vadd.xlane.f32.xlu1 %v278_v6  ;;  %v168_v52 = vpop.xlane.xlu0 %167 }
 0x122   :  { %v209_v8 = vmul.f32 %v818_v18, %v168_v52 }
 0x123   :  { %v882_v9 = vsub.f32 %v790_v61, %v214_v7  ;;  %v885_v11 = vsub.f32 %v784_v57, %v213_v51 }
 0x124   :  { %v888_v12 = vsub.f32 %v787_v59, %v209_v8 }
 0x125   :  { %v245_v13 = vmul.f32 %v885_v11, %v885_v11  ;;  %v246_v14 = vmul.f32 %v882_v9, %v882_v9 }
 0x126   :  { %v241_v15 = vmul.f32 %v888_v12, %v888_v12 }
 0x127   :  { %v281_v16 = vsel %vm147_vm1, %v245_v13, 0.0  ;;  %v284_v57 = vsel %vm147_vm1, %v246_v14, 0.0 }
 0x128   :  { %v192_v17 = vpop.xlane.xlu2 %191  ;;  %v159_v61 = vpop.xlane.xlu1 %158  ;;  %282 = vadd.xlane.f32.xlu2 %v281_v16  ;;  %v269_v19 = vsel %vm147_vm1, %v241_v15, 0.0 }
 0x129   :  { %v217_v59 = vmul.f32 %v818_v18, %v192_v17  ;;  %v206_v20 = vmul.f32 %v818_v18, %v159_v61  ;;  %285 = vadd.xlane.f32.xlu0 %v284_v57  ;;  %270 = vadd.xlane.f32.xlu1 %v269_v19  ;;  %v195_v21 = vpop.xlane.xlu0 %194 }
 0x12a   :  { %v218_v26 = vmul.f32 %v818_v18, %v195_v21  ;;  %v955_v21 = vld [vmem:[%s1163_s3] ss:$0 sm:$0xff] }
 0x12b   :  { %v902_v22 = vsub.f32 %v799_v3, %v217_v59  ;;  %v905_v25 = vsub.f32 %v805_v5, %v206_v20  ;;  %v216_v5 = vmul.f32 %v818_v18, %v846_v39 }
 0x12c   :  { %v913_v29 = vsub.f32 %v802_v4, %v218_v26 }
 0x12d   :  { %v249_v27 = vmul.f32 %v902_v22, %v902_v22  ;;  %v238_v28 = vmul.f32 %v905_v25, %v905_v25  ;;  %v928_v40 = vsub.f32 %v765_v46, %v216_v5 }
 0x12e   :  { %v250_v38 = vmul.f32 %v913_v29, %v913_v29 }
 0x12f   :  { %v293_v31 = vsel %vm147_vm1, %v249_v27, 0.0  ;;  %v260_v3 = vsel %vm147_vm1, %v238_v28, 0.0  ;;  %v248_v39 = vmul.f32 %v928_v40, %v928_v40 }
 0x130   :  { %v171_v32 = vpop.xlane.xlu1 %170  ;;  %v296_v44 = vsel %vm147_vm1, %v250_v38, 0.0 }
 0x131   :  { %v210_v33 = vmul.f32 %v818_v18, %v171_v32  ;;  %294 = vadd.xlane.f32.xlu0 %v293_v31  ;;  %261 = vadd.xlane.f32.xlu1 %v260_v3  ;;  %v963_v31 = vld [vmem:[%s1164_s4] ss:$0 sm:$0xff] }
 0x133   :  { %v921_v35 = vsub.f32 %v814_v10, %v210_v33  ;;  %v290_v10 = vsel %vm147_vm1, %v248_v39, 0.0 }
 0x135   :  { %v242_v4 = vmul.f32 %v921_v35, %v921_v35 }
 0x137   :  { %v272_v41 = vsel %vm147_vm1, %v242_v4, 0.0 }
 0x138   :  { %273 = vadd.xlane.f32.xlu2 %v272_v41 }
 0x139   :  { %297 = vadd.xlane.f32.xlu1 %v296_v44 }
 0x140   :  { %291 = vadd.xlane.f32.xlu2 %v290_v10 }
 0x17c   :  { %v265_v36 = vpop.xlane.xlu2 %264  ;;  %v253_v45 = vpop.xlane.xlu1 %252 }
 0x17d   :  { %v303_v37 = vmul.f32 %v265_v36, %v818_v18  ;;  %v299_v49 = vmul.f32 %v253_v45, %v818_v18 }
 0x17f   :  { %v319_v46 = vadd.f32 1e-06, %v303_v37  ;;  %v315_v50 = vadd.f32 1e-06, %v299_v49 }
 0x181   :  { %605 = vrsqrt.f32 %v319_v46  ;;  %vm377_vm5 = vweird.f32 %v319_v46  ;;  %vm337_vm7 = vweird.f32 %v315_v50 }
 0x182   :  { %607 = vrsqrt.f32 %v315_v50 }
 0x184   :  { %v289_v53 = vpop.xlane.xlu1 %288  ;;  %v277_v54 = vpop.xlane.xlu0 %276 }
 0x185   :  { %v311_v55 = vmul.f32 %v289_v53, %v818_v18  ;;  %v307_v56 = vmul.f32 %v277_v54, %v818_v18 }
 0x187   :  { %v606_v43 = vpop.eup %605  ;;  %v939_v58 = vadd.f32 1e-06, %v311_v55  ;;  %v941_v62 = vadd.f32 1e-06, %v307_v56 }
 0x188   :  { %v608_v63 = vpop.eup %607  ;;  %v372_v0 = vmul.f32 %v606_v43, %v319_v46  ;;  %vm378_vm3 = vweird.f32 %v606_v43 }
 0x189   :  { %v332_v1 = vmul.f32 %v608_v63, %v315_v50  ;;  %609 = vrsqrt.f32 %v939_v58  ;;  %vm338_vm4 = vweird.f32 %v608_v63  ;;  %vm379_vm6 = vmor %vm377_vm5, %vm378_vm3  ;;  %vm457_vm11 = vweird.f32 %v939_v58 }
 0x18a   :  { %v373_v2 = vmul.f32 %v606_v43, %v372_v0  ;;  %611 = vrsqrt.f32 %v941_v62  ;;  %vm339_vm8 = vmor %vm337_vm7, %vm338_vm4  ;;  %vm417_vm13 = vweird.f32 %v941_v62 }
 0x18b   :  { %v333_v6 = vmul.f32 %v608_v63, %v332_v1 }
 0x18c   :  { %v374_v7 = vmul.f32 0.5, %v373_v2  ;;  %v256_v51 = vpop.xlane.xlu2 %255  ;;  %v268_v52 = vpop.xlane.xlu0 %267 }
 0x18d   :  { %v334_v8 = vmul.f32 0.5, %v333_v6  ;;  %v300_v13 = vmul.f32 %v256_v51, %v818_v18  ;;  %v304_v14 = vmul.f32 %v268_v52, %v818_v18 }
 0x18e   :  { %v375_v15 = vsub.f32 1.5, %v374_v7 }
 0x18f   :  { %v610_v16 = vpop.eup %609  ;;  %v335_v17 = vsub.f32 1.5, %v334_v8  ;;  %v947_v61 = vadd.f32 1e-06, %v300_v13  ;;  %v949_v57 = vadd.f32 1e-06, %v304_v14 }
 0x190   :  { %v612_v19 = vpop.eup %611  ;;  %v376_v59 = vmul.f32 %v606_v43, %v375_v15  ;;  %v452_v20 = vmul.f32 %v610_v16, %v939_v58  ;;  %vm458_vm9 = vweird.f32 %v610_v16 }
 0x191   :  { %v336_v26 = vmul.f32 %v608_v63, %v335_v17  ;;  %v412_v27 = vmul.f32 %v612_v19, %v941_v62  ;;  %613 = vrsqrt.f32 %v947_v61  ;;  %vm418_vm10 = vweird.f32 %v612_v19  ;;  %vm459_vm12 = vmor %vm457_vm11, %vm458_vm9 }
 0x192   :  { %v380_v28 = vsel %vm379_vm6, %v606_v43, %v376_v59  ;;  %v453_v32 = vmul.f32 %v610_v16, %v452_v20  ;;  %615 = vrsqrt.f32 %v949_v57  ;;  %vm419_vm14 = vmor %vm417_vm13, %vm418_vm10  ;;  %vm347_vm15 = vweird.f32 %v947_v61 }
 0x193   :  { %v495_v3 = vmul.f32 %v380_v28, %v823_v23  ;;  %v340_v33 = vsel %vm339_vm8, %v608_v63, %v336_v26  ;;  %v413_v5 = vmul.f32 %v612_v19, %v412_v27  ;;  %vm387_vm4 = vweird.f32 %v949_v57 }
 0x194   :  { %v491_v38 = vmul.f32 %v340_v33, %v826_v24  ;;  %v454_v4 = vmul.f32 0.5, %v453_v32  ;;  %v280_v41 = vpop.xlane.xlu1 %279  ;;  %v259_v44 = vpop.xlane.xlu0 %258 }
 0x195   :  { %v515_v39 = vmul.f32 %v955_v21, %v495_v3  ;;  %v414_v10 = vmul.f32 0.5, %v413_v5  ;;  %v308_v36 = vmul.f32 %v280_v41, %v818_v18  ;;  %v301_v45 = vmul.f32 %v259_v44, %v818_v18 }
 0x196   :  { %v511_v37 = vmul.f32 %v955_v21, %v491_v38  ;;  %v455_v49 = vsub.f32 1.5, %v454_v4 }
 0x197   :  { %v614_v23 = vpop.eup %613  ;;  %v535_v46 = vadd.f32 %v963_v31, %v515_v39  ;;  %v415_v50 = vsub.f32 1.5, %v414_v10  ;;  %v972_v24 = vadd.f32 1e-06, %v308_v36  ;;  %v974_v53 = vadd.f32 1e-06, %v301_v45 }
 0x198   :  { %v616_v54 = vpop.eup %615  ;;  %v531_v55 = vadd.f32 %v963_v31, %v511_v37  ;;  %v456_v56 = vmul.f32 %v610_v16, %v455_v49  ;;  %v342_v43 = vmul.f32 %v614_v23, %v947_v61  ;;  %vm348_vm0 = vweird.f32 %v614_v23 }
 0x199   :  { %551 = vst.msk [vmem:[%s1165_s5 + $0x20] sm:$0xff] %vm147_vm1, %v535_v46  ;;  %v416_v63 = vmul.f32 %v612_v19, %v415_v50  ;;  %v382_v0 = vmul.f32 %v616_v54, %v949_v57  ;;  %617 = vrsqrt.f32 %v972_v24  ;;  %vm388_vm2 = vweird.f32 %v616_v54  ;;  %vm349_vm3 = vmor %vm347_vm15, %vm348_vm0 }
 0x19a   :  { %547 = vst.msk [vmem:[%s1165_s5] sm:$0xff] %vm147_vm1, %v531_v55  ;;  %v460_v58 = vsel %vm459_vm12, %v610_v16, %v456_v56  ;;  %v343_v1 = vmul.f32 %v614_v23, %v342_v43  ;;  %619 = vrsqrt.f32 %v974_v53  ;;  %vm389_vm5 = vmor %vm387_vm4, %vm388_vm2  ;;  %vm427_vm8 = vweird.f32 %v972_v24 }
 0x19b   :  { %v503_v2 = vmul.f32 %v460_v58, %v840_v34  ;;  %v420_v6 = vsel %vm419_vm14, %v612_v19, %v416_v63  ;;  %v383_v7 = vmul.f32 %v616_v54, %v382_v0  ;;  %v283_v62 = vpop.xlane.xlu2 %282  ;;  %vm357_vm10 = vweird.f32 %v974_v53 }
 0x19c   :  { %v499_v51 = vmul.f32 %v420_v6, %v837_v30  ;;  %v344_v52 = vmul.f32 0.5, %v343_v1  ;;  %v309_v8 = vmul.f32 %v283_v62, %v818_v18  ;;  %v271_v13 = vpop.xlane.xlu1 %270  ;;  %v286_v14 = vpop.xlane.xlu0 %285 }
 0x19d   :  { %v523_v15 = vmul.f32 %v955_v21, %v503_v2  ;;  %v384_v16 = vmul.f32 0.5, %v383_v7  ;;  %v305_v17 = vmul.f32 %v271_v13, %v818_v18  ;;  %v310_v59 = vmul.f32 %v286_v14, %v818_v18 }
 0x19e   :  { %v519_v34 = vmul.f32 %v955_v21, %v499_v51  ;;  %v345_v19 = vsub.f32 1.5, %v344_v52  ;;  %v1000_v20 = vadd.f32 1e-06, %v309_v8 }
 0x19f   :  { %v618_v30 = vpop.eup %617  ;;  %v543_v26 = vadd.f32 %v963_v31, %v523_v15  ;;  %v385_v27 = vsub.f32 1.5, %v384_v16  ;;  %v1003_v28 = vadd.f32 1e-06, %v305_v17  ;;  %v1007_v38 = vadd.f32 1e-06, %v310_v59 }
 0x1a0   :  { %v620_v32 = vpop.eup %619  ;;  %v539_v3 = vadd.f32 %v963_v31, %v519_v34  ;;  %v346_v33 = vmul.f32 %v614_v23, %v345_v19  ;;  %v422_v5 = vmul.f32 %v618_v30, %v972_v24  ;;  %621 = vrsqrt.f32 %v1000_v20 }
 0x1a1   :  { %559 = vst.msk [vmem:[%s1165_s5 + $0x60] sm:$0xff] %vm147_vm1, %v543_v26  ;;  %v386_v4 = vmul.f32 %v616_v54, %v385_v27  ;;  %v352_v41 = vmul.f32 %v620_v32, %v974_v53  ;;  %623 = vrsqrt.f32 %v1003_v28  ;;  %vm428_vm6 = vweird.f32 %v618_v30 }
 0x1a2   :  { %555 = vst.msk [vmem:[%s1165_s5 + $0x40] sm:$0xff] %vm147_vm1, %v539_v3  ;;  %v350_v44 = vsel %vm349_vm3, %v614_v23, %v346_v33  ;;  %v423_v39 = vmul.f32 %v618_v30, %v422_v5  ;;  %625 = vrsqrt.f32 %v1007_v38  ;;  %vm358_vm7 = vweird.f32 %v620_v32  ;;  %vm429_vm9 = vmor %vm427_vm8, %vm428_vm6 }
 0x1a3   :  { %v492_v61 = vmul.f32 %v350_v44, %v856_v48  ;;  %v390_v10 = vsel %vm389_vm5, %v616_v54, %v386_v4  ;;  %v353_v36 = vmul.f32 %v620_v32, %v352_v41  ;;  %vm359_vm11 = vmor %vm357_vm10, %vm358_vm7  ;;  %vm437_vm12 = vweird.f32 %v1000_v20 }
 0x1a4   :  { %v496_v57 = vmul.f32 %v390_v10, %v853_v47  ;;  %v424_v45 = vmul.f32 0.5, %v423_v39  ;;  %v262_v37 = vpop.xlane.xlu1 %261  ;;  %v295_v49 = vpop.xlane.xlu0 %294  ;;  %vm397_vm13 = vweird.f32 %v1003_v28  ;;  %vm447_vm4 = vweird.f32 %v1007_v38 }
 0x1a5   :  { %v512_v46 = vmul.f32 %v955_v21, %v492_v61  ;;  %v354_v50 = vmul.f32 0.5, %v353_v36  ;;  %v302_v23 = vmul.f32 %v262_v37, %v818_v18  ;;  %v313_v55 = vmul.f32 %v295_v49, %v818_v18 }
 0x1a6   :  { %v516_v56 = vmul.f32 %v955_v21, %v496_v57  ;;  %v425_v43 = vsub.f32 1.5, %v424_v45  ;;  %v1031_v48 = vpop.eup %621 }
 0x1a7   :  { %v532_v47 = vadd.f32 %v963_v31, %v512_v46  ;;  %v355_v54 = vsub.f32 1.5, %v354_v50  ;;  %v1034_v63 = vadd.f32 1e-06, %v302_v23  ;;  %v1036_v0 = vadd.f32 1e-06, %v313_v55  ;;  %v1038_v58 = vpop.eup %623 }
 0x1a8   :  { %v536_v1 = vadd.f32 %v963_v31, %v516_v56  ;;  %v426_v2 = vmul.f32 %v618_v30, %v425_v43  ;;  %v432_v6 = vmul.f32 %v1031_v48, %v1000_v20  ;;  %v392_v62 = vmul.f32 %v1038_v58, %v1003_v28  ;;  %v626_v51 = vpop.eup %625 }
 0x1a9   :  { %548 = vst.msk [vmem:[%s1165_s5 + $0x8] sm:$0xff] %vm147_vm1, %v532_v47  ;;  %v356_v7 = vmul.f32 %v620_v32, %v355_v54  ;;  %627 = vrsqrt.f32 %v1034_v63  ;;  %v442_v14 = vmul.f32 %v626_v51, %v1007_v38  ;;  %vm438_vm14 = vweird.f32 %v1031_v48 }
 0x1aa   :  { %552 = vst.msk [vmem:[%s1165_s5 + $0x28] sm:$0xff] %vm147_vm1, %v536_v1  ;;  %v430_v24 = vsel %vm429_vm9, %v618_v30, %v426_v2  ;;  %v433_v52 = vmul.f32 %v1031_v48, %v432_v6  ;;  %629 = vrsqrt.f32 %v1036_v0  ;;  %v393_v13 = vmul.f32 %v1038_v58, %v392_v62  ;;  %vm439_vm0 = vmor %vm437_vm12, %vm438_vm14 }
 0x1ab   :  { %v500_v53 = vmul.f32 %v430_v24, %v870_v60  ;;  %v360_v8 = vsel %vm359_vm11, %v620_v32, %v356_v7  ;;  %v274_v15 = vpop.xlane.xlu2 %273  ;;  %v443_v19 = vmul.f32 %v626_v51, %v442_v14  ;;  %vm398_vm15 = vweird.f32 %v1038_v58 }
 0x1ac   :  { %v493_v16 = vmul.f32 %v360_v8, %v867_v42  ;;  %v434_v17 = vmul.f32 0.5, %v433_v52  ;;  %v394_v34 = vmul.f32 0.5, %v393_v13  ;;  %v306_v30 = vmul.f32 %v274_v15, %v818_v18  ;;  %v298_v60 = vpop.xlane.xlu1 %297  ;;  %vm399_vm3 = vmor %vm397_vm13, %vm398_vm15 }
 0x1ad   :  { %v520_v59 = vmul.f32 %v955_v21, %v500_v53  ;;  %v444_v33 = vmul.f32 0.5, %v443_v19  ;;  %v314_v61 = vmul.f32 %v298_v60, %v818_v18  ;;  %vm448_vm2 = vweird.f32 %v626_v51 }
 0x1ae   :  { %v513_v26 = vmul.f32 %v955_v21, %v493_v16  ;;  %v435_v27 = vsub.f32 1.5, %v434_v17  ;;  %v395_v3 = vsub.f32 1.5, %v394_v34  ;;  %v1071_v5 = vadd.f32 1e-06, %v306_v30  ;;  %vm449_vm5 = vmor %vm447_vm4, %vm448_vm2 }
 0x1af   :  { %v628_v42 = vpop.eup %627  ;;  %v540_v32 = vadd.f32 %v963_v31, %v520_v59  ;;  %v445_v36 = vsub.f32 1.5, %v444_v33  ;;  %v330_v43 = vadd.f32 1e-06, %v314_v61  ;;  %vm367_vm8 = vweird.f32 %v1034_v63 }
 0x1b0   :  { %v630_v4 = vpop.eup %629  ;;  %v533_v41 = vadd.f32 %v963_v31, %v513_v26  ;;  %v436_v44 = vmul.f32 %v1031_v48, %v435_v27  ;;  %v362_v39 = vmul.f32 %v628_v42, %v1034_v63  ;;  %v396_v10 = vmul.f32 %v1038_v58, %v395_v3 }
 0x1b1   :  { %556 = vst.msk [vmem:[%s1165_s5 + $0x48] sm:$0xff] %vm147_vm1, %v540_v32  ;;  %v472_v57 = vmul.f32 %v630_v4, %v1036_v0  ;;  %631 = vrsqrt.f32 %v1071_v5  ;;  %v446_v46 = vmul.f32 %v626_v51, %v445_v36  ;;  %vm368_vm6 = vweird.f32 %v628_v42 }
 0x1b2   :  { %549 = vst.msk [vmem:[%s1165_s5 + $0x10] sm:$0xff] %vm147_vm1, %v533_v41  ;;  %v440_v45 = vsel %vm439_vm0, %v1031_v48, %v436_v44  ;;  %v363_v20 = vmul.f32 %v628_v42, %v362_v39  ;;  %v400_v49 = vsel %vm399_vm3, %v1038_v58, %v396_v10  ;;  %633 = vrsqrt.f32 %v330_v43  ;;  %vm369_vm9 = vmor %vm367_vm8, %vm368_vm6 }
 0x1b3   :  { %v501_v37 = vmul.f32 %v440_v45, %v885_v11  ;;  %v473_v50 = vmul.f32 %v630_v4, %v472_v57  ;;  %v292_v23 = vpop.xlane.xlu2 %291  ;;  %v497_v55 = vmul.f32 %v400_v49, %v888_v12  ;;  %v450_v38 = vsel %vm449_vm5, %v626_v51, %v446_v46 }
 0x1b4   :  { %v364_v56 = vmul.f32 0.5, %v363_v20  ;;  %v312_v28 = vmul.f32 %v292_v23, %v818_v18  ;;  %v502_v11 = vmul.f32 %v450_v38, %v882_v9  ;;  %vm478_vm7 = vweird.f32 %v630_v4 }
 0x1b5   :  { %v521_v48 = vmul.f32 %v955_v21, %v501_v37  ;;  %v474_v47 = vmul.f32 0.5, %v473_v50  ;;  %v517_v54 = vmul.f32 %v955_v21, %v497_v55  ;;  %vm477_vm10 = vweird.f32 %v1036_v0 }
 0x1b6   :  { %v365_v58 = vsub.f32 1.5, %v364_v56  ;;  %v328_v12 = vadd.f32 1e-06, %v312_v28  ;;  %v522_v18 = vmul.f32 %v955_v21, %v502_v11  ;;  %vm479_vm11 = vmor %vm477_vm10, %vm478_vm7  ;;  %vm407_vm13 = vweird.f32 %v1071_v5 }
 0x1b7   :  { %v541_v1 = vadd.f32 %v963_v31, %v521_v48  ;;  %v475_v2 = vsub.f32 1.5, %v474_v47  ;;  %v632_v6 = vpop.eup %631  ;;  %v537_v7 = vadd.f32 %v963_v31, %v517_v54  ;;  %vm487_vm0 = vweird.f32 %v330_v43 }
 0x1b8   :  { %v366_v62 = vmul.f32 %v628_v42, %v365_v58  ;;  %v402_v51 = vmul.f32 %v632_v6, %v1071_v5  ;;  %635 = vrsqrt.f32 %v328_v12  ;;  %v542_v63 = vadd.f32 %v963_v31, %v522_v18  ;;  %v634_v13 = vpop.eup %633 }
 0x1b9   :  { %557 = vst.msk [vmem:[%s1165_s5 + $0x50] sm:$0xff] %vm147_vm1, %v541_v1  ;;  %v476_v9 = vmul.f32 %v630_v4, %v475_v2  ;;  %v482_v16 = vmul.f32 %v634_v13, %v330_v43  ;;  %vm408_vm12 = vweird.f32 %v632_v6  ;;  %vm488_vm15 = vweird.f32 %v634_v13 }
 0x1ba   :  { %553 = vst.msk [vmem:[%s1165_s5 + $0x30] sm:$0xff] %vm147_vm1, %v537_v7  ;;  %v370_v24 = vsel %vm369_vm9, %v628_v42, %v366_v62  ;;  %v403_v8 = vmul.f32 %v632_v6, %v402_v51  ;;  %vm409_vm14 = vmor %vm407_vm13, %vm408_vm12  ;;  %vm467_vm4 = vweird.f32 %v328_v12 }
 0x1bb   :  { %v494_v52 = vmul.f32 %v370_v24, %v905_v25  ;;  %v480_v53 = vsel %vm479_vm11, %v630_v4, %v476_v9  ;;  %558 = vst.msk [vmem:[%s1165_s5 + $0x58] sm:$0xff] %vm147_vm1, %v542_v63  ;;  %v483_v19 = vmul.f32 %v634_v13, %v482_v16  ;;  %vm489_vm2 = vmor %vm487_vm0, %vm488_vm15 }
 0x1bc   :  { %v505_v0 = vmul.f32 %v480_v53, %v902_v22  ;;  %v404_v15 = vmul.f32 0.5, %v403_v8 }
 0x1bd   :  { %v514_v14 = vmul.f32 %v955_v21, %v494_v52  ;;  %v484_v26 = vmul.f32 0.5, %v483_v19 }
 0x1be   :  { %v525_v17 = vmul.f32 %v955_v21, %v505_v0  ;;  %v636_v59 = vpop.eup %635  ;;  %v405_v25 = vsub.f32 1.5, %v404_v15 }
 0x1bf   :  { %v534_v34 = vadd.f32 %v963_v31, %v514_v14  ;;  %v462_v60 = vmul.f32 %v636_v59, %v328_v12  ;;  %v485_v32 = vsub.f32 1.5, %v484_v26  ;;  %vm468_vm3 = vweird.f32 %v636_v59 }
 0x1c0   :  { %v545_v30 = vadd.f32 %v963_v31, %v525_v17  ;;  %v406_v22 = vmul.f32 %v632_v6, %v405_v25  ;;  %vm469_vm5 = vmor %vm467_vm4, %vm468_vm3 }
 0x1c1   :  { %550 = vst.msk [vmem:[%s1165_s5 + $0x18] sm:$0xff] %vm147_vm1, %v534_v34  ;;  %v463_v27 = vmul.f32 %v636_v59, %v462_v60  ;;  %v486_v4 = vmul.f32 %v634_v13, %v485_v32 }
 0x1c2   :  { %561 = vst.msk [vmem:[%s1165_s5 + $0x70] sm:$0xff] %vm147_vm1, %v545_v30  ;;  %v410_v42 = vsel %vm409_vm14, %v632_v6, %v406_v22 }
 0x1c3   :  { %v498_v3 = vmul.f32 %v410_v42, %v921_v35  ;;  %v464_v33 = vmul.f32 0.5, %v463_v27  ;;  %v490_v44 = vsel %vm489_vm2, %v634_v13, %v486_v4 }
 0x1c4   :  { %v506_v61 = vmul.f32 %v490_v44, %v913_v29 }
 0x1c5   :  { %v518_v41 = vmul.f32 %v955_v21, %v498_v3  ;;  %v465_v5 = vsub.f32 1.5, %v464_v33 }
 0x1c6   :  { %v526_v35 = vmul.f32 %v955_v21, %v506_v61 }
 0x1c7   :  { %v538_v39 = vadd.f32 %v963_v31, %v518_v41  ;;  %v466_v10 = vmul.f32 %v636_v59, %v465_v5 }
 0x1c8   :  { %v546_v45 = vadd.f32 %v963_v31, %v526_v35 }
 0x1c9   :  { %554 = vst.msk [vmem:[%s1165_s5 + $0x38] sm:$0xff] %vm147_vm1, %v538_v39  ;;  %v470_v36 = vsel %vm469_vm5, %v636_v59, %v466_v10 }
 0x1ca   :  { %v504_v57 = vmul.f32 %v470_v36, %v928_v40  ;;  %562 = vst.msk [vmem:[%s1165_s5 + $0x78] sm:$0xff] %vm147_vm1, %v546_v45 }
 0x1cc   :  { %v524_v20 = vmul.f32 %v955_v21, %v504_v57 }
 0x1ce   :  { %v544_v29 = vadd.f32 %v963_v31, %v524_v20 }
 0x1d0   :  { %560 = vst.msk [vmem:[%s1165_s5 + $0x68] sm:$0xff] %vm147_vm1, %v544_v29 }

</bundles_post_ra>
